<compile_context>
chip_gen: v7x
topology: tpu7x:2x2x1
jax: 0.10.0
libtpu: 0.0.40
codegen_flags: <defaults>
</compile_context>

<pallas_src>
import functools

import jax
import jax.numpy as jnp
from jax.experimental import pallas as pl
from jax.experimental.pallas import tpu as pltpu


# ----------------------------------------------------------------------------
# Kernel: fused 3-layer MLP for all three heads, single lane-dense output.
# ----------------------------------------------------------------------------
def _vpg_fused_kernel(x_ref, w1_ref, b1_ref, w2_ref, b2_ref, w3_ref, b3_ref,
                      out_ref, *, action_dim):
    x = x_ref[...]

    h1 = jnp.dot(x, w1_ref[...], preferred_element_type=jnp.float32) + b1_ref[...]
    h1 = jnp.maximum(h1, 0.0)                                       # ReLU (all heads)

    h2 = jnp.dot(h1, w2_ref[...], preferred_element_type=jnp.float32) + b2_ref[...]
    h2 = jnp.maximum(h2, 0.0)                                       # ReLU (all heads)

    h3 = jnp.dot(h2, w3_ref[...], preferred_element_type=jnp.float32) + b3_ref[...]

    # Per-segment activations selected by lane index:
    #   [0, A)      -> tanh      (actor_mean)
    #   [A, 2A)     -> sigmoid   (actor_var)
    #   [2A, ...)   -> identity  (critic value + zero padding)
    col = jax.lax.broadcasted_iota(jnp.int32, h3.shape, 1)
    tanh_v = jnp.tanh(h3)
    # exp + approx reciprocal both issue on the EUP slot (idle otherwise).
    sig_v = pl.reciprocal(1.0 + jnp.exp(-h3), approx=True)
    out_ref[...] = jnp.where(col < action_dim, tanh_v,
                             jnp.where(col < 2 * action_dim, sig_v, h3))


# ----------------------------------------------------------------------------
# Parameter init (mimics PyTorch nn.Linear default init) + host-side packing.
# ----------------------------------------------------------------------------
def init_linear(key, in_dim, out_dim):
    kw, kb = jax.random.split(key)
    bound = 1.0 / jnp.sqrt(jnp.float32(in_dim))
    w = jax.random.uniform(kw, (in_dim, out_dim), jnp.float32, -bound, bound)
    b = jax.random.uniform(kb, (1, out_dim), jnp.float32, -bound, bound)
    return w, b


def init_vpg_params(key, state_dim, action_dim, h1=64, h2=32):
    """Returns the 18 raw per-head arrays (weights stored [in, out])."""
    keys = jax.random.split(key, 9)
    params = []
    dims = [(state_dim, h1), (h1, h2)]
    for head, out_last in enumerate([action_dim, action_dim, 1]):
        head_dims = dims + [(h2, out_last)]
        for j, (di, do) in enumerate(head_dims):
            w, b = init_linear(keys[head * 3 + j], di, do)
            params.append(w)
            params.append(b)
    return params  # wm1,bm1,wm2,bm2,wm3,bm3, wv1,...,bv3, wc1,...,bc3


def pack_vpg_params(params, *, out_pad=128):
    """Pack 18 arrays into 6 fused / block-diagonal operands (done once, host-side)."""
    (wm1, bm1, wm2, bm2, wm3, bm3,
     wv1, bv1, wv2, bv2, wv3, bv3,
     wc1, bc1, wc2, bc2, wc3, bc3) = params

    h1 = wm1.shape[1]
    h2 = wm2.shape[1]
    a = wm3.shape[1]
    out_dim = 2 * a + 1
    assert out_pad >= out_dim

    # Layer 1: plain concat along the output axis.
    w1_all = jnp.concatenate([wm1, wv1, wc1], axis=1)                   # [S, 3*H1]
    b1_all = jnp.concatenate([bm1, bv1, bc1], axis=1)                   # [1, 3*H1]

    # Layer 2: block-diagonal [3*H1, 3*H2].
    w2_all = jnp.zeros((3 * h1, 3 * h2), jnp.float32)
    w2_all = w2_all.at[0 * h1:1 * h1, 0 * h2:1 * h2].set(wm2)
    w2_all = w2_all.at[1 * h1:2 * h1, 1 * h2:2 * h2].set(wv2)
    w2_all = w2_all.at[2 * h1:3 * h1, 2 * h2:3 * h2].set(wc2)
    b2_all = jnp.concatenate([bm2, bv2, bc2], axis=1)                   # [1, 3*H2]

    # Layer 3: block-diagonal [3*H2, out_pad] (lane-dense, zero-padded to 128).
    w3_all = jnp.zeros((3 * h2, out_pad), jnp.float32)
    w3_all = w3_all.at[0 * h2:1 * h2, 0:a].set(wm3)
    w3_all = w3_all.at[1 * h2:2 * h2, a:2 * a].set(wv3)
    w3_all = w3_all.at[2 * h2:3 * h2, 2 * a:2 * a + 1].set(wc3)
    b3_all = jnp.zeros((1, out_pad), jnp.float32)
    b3_all = b3_all.at[:, 0:a].set(bm3)
    b3_all = b3_all.at[:, a:2 * a].set(bv3)
    b3_all = b3_all.at[:, 2 * a:2 * a + 1].set(bc3)

    return (w1_all, b1_all, w2_all, b2_all, w3_all, b3_all), a


# ----------------------------------------------------------------------------
# Wrapper
# ----------------------------------------------------------------------------
def vpg_forward(x, packed_params, action_dim, *, out_pad=128):
    """Returns (actor_mean(x), actor_var(x), squeeze(critic(x)))."""
    B = x.shape[0]
    vmem_spec = pl.BlockSpec(memory_space=pltpu.MemorySpace.VMEM)
    n_inputs = 1 + len(packed_params)

    out = pl.pallas_call(
        functools.partial(_vpg_fused_kernel, action_dim=action_dim),
        out_shape=jax.ShapeDtypeStruct((B, out_pad), jnp.float32),
        in_specs=[vmem_spec] * n_inputs,
        out_specs=vmem_spec,
    )(x, *packed_params)

    mean = out[:, :action_dim]
    var = out[:, action_dim:2 * action_dim]
    value = jnp.squeeze(out[:, 2 * action_dim:2 * action_dim + 1])
    return mean, var, value


# ----------------------------------------------------------------------------
# Pure-JAX reference (uses the original 18 unpacked arrays).
# ----------------------------------------------------------------------------
def reference_forward(x, params):
    def mlp(x, w1, b1, w2, b2, w3, b3):
        h1 = jnp.maximum(x @ w1 + b1, 0.0)
        h2 = jnp.maximum(h1 @ w2 + b2, 0.0)
        return h2 @ w3 + b3

    (wm1, bm1, wm2, bm2, wm3, bm3,
     wv1, bv1, wv2, bv2, wv3, bv3,
     wc1, bc1, wc2, bc2, wc3, bc3) = params
    mean = jnp.tanh(mlp(x, wm1, bm1, wm2, bm2, wm3, bm3))
    var = jax.nn.sigmoid(mlp(x, wv1, bv1, wv2, bv2, wv3, bv3))
    value = jnp.squeeze(mlp(x, wc1, bc1, wc2, bc2, wc3, bc3))
    return mean, var, value


if __name__ == "__main__":
    key = jax.random.PRNGKey(0)
    k_params, k_x = jax.random.split(key)

    B, STATE_DIM, ACTION_DIM = 8, 16, 4
    raw_params = init_vpg_params(k_params, STATE_DIM, ACTION_DIM)
    packed_params, a_dim = pack_vpg_params(raw_params)
    x = jax.random.normal(k_x, (B, STATE_DIM), dtype=jnp.float32)

    mean, var, value = vpg_forward(x, packed_params, a_dim)
    jax.block_until_ready((mean, var, value))

    ref_mean, ref_var, ref_value = reference_forward(x, raw_params)
    assert mean.shape == (B, ACTION_DIM)
    assert var.shape == (B, ACTION_DIM)
    assert value.shape == (B,)
    assert jnp.allclose(mean, ref_mean, atol=1e-5)
    # var uses the EUP approx reciprocal (~1e-3 relative) -> slightly looser tol.
    assert jnp.allclose(var, ref_var, atol=2e-3)
    assert jnp.allclose(value, ref_value, atol=1e-5)

    print("KERNEL_OK")
</pallas_src>

<mosaic_0001>
module attributes {stable_mosaic.version = 11 : i64} {
  func.func @_vpg_fused_kernel(%arg0: memref<8x16xf32, #tpu.memory_space<vmem>>, %arg1: memref<16x192xf32, #tpu.memory_space<vmem>>, %arg2: memref<1x192xf32, #tpu.memory_space<vmem>>, %arg3: memref<192x96xf32, #tpu.memory_space<vmem>>, %arg4: memref<1x96xf32, #tpu.memory_space<vmem>>, %arg5: memref<96x128xf32, #tpu.memory_space<vmem>>, %arg6: memref<1x128xf32, #tpu.memory_space<vmem>>, %arg7: memref<8x128xf32, #tpu.memory_space<vmem>>) attributes {dimension_semantics = [], scalar_prefetch = 0 : i64, scratch_operands = 0 : i64, tpu.core_type = #tpu.core_type<tc>} {
    %c0 = arith.constant 0 : index
    %c0_0 = arith.constant 0 : index
    %0 = vector.load %arg0[%c0, %c0_0] : memref<8x16xf32, #tpu.memory_space<vmem>>, vector<8x16xf32>
    %c0_1 = arith.constant 0 : index
    %c0_2 = arith.constant 0 : index
    %1 = vector.load %arg1[%c0_1, %c0_2] : memref<16x192xf32, #tpu.memory_space<vmem>>, vector<16x192xf32>
    %cst = arith.constant dense<0.000000e+00> : vector<8x192xf32>
    %2 = tpu.matmul %0, %1, %cst {dimension_numbers = #tpu.dot_dimension_numbers<[1], [0], [0], [1], [0, 0, 1, 1], [], []>} : vector<8x16xf32>, vector<16x192xf32>, vector<8x192xf32> -> vector<8x192xf32>
    %c0_3 = arith.constant 0 : index
    %c0_4 = arith.constant 0 : index
    %3 = vector.load %arg2[%c0_3, %c0_4] : memref<1x192xf32, #tpu.memory_space<vmem>>, vector<1x192xf32>
    %4 = vector.broadcast %3 : vector<1x192xf32> to vector<8x192xf32>
    %5 = arith.addf %2, %4 : vector<8x192xf32>
    %cst_5 = arith.constant 0.000000e+00 : f32
    %6 = vector.broadcast %cst_5 : f32 to vector<8x192xf32>
    %7 = arith.maximumf %5, %6 : vector<8x192xf32>
    %c0_6 = arith.constant 0 : index
    %c0_7 = arith.constant 0 : index
    %8 = vector.load %arg3[%c0_6, %c0_7] : memref<192x96xf32, #tpu.memory_space<vmem>>, vector<192x96xf32>
    %cst_8 = arith.constant dense<0.000000e+00> : vector<8x96xf32>
    %9 = tpu.matmul %7, %8, %cst_8 {dimension_numbers = #tpu.dot_dimension_numbers<[1], [0], [0], [1], [0, 0, 1, 1], [], []>} : vector<8x192xf32>, vector<192x96xf32>, vector<8x96xf32> -> vector<8x96xf32>
    %c0_9 = arith.constant 0 : index
    %c0_10 = arith.constant 0 : index
    %10 = vector.load %arg4[%c0_9, %c0_10] : memref<1x96xf32, #tpu.memory_space<vmem>>, vector<1x96xf32>
    %11 = vector.broadcast %10 : vector<1x96xf32> to vector<8x96xf32>
    %12 = arith.addf %9, %11 : vector<8x96xf32>
    %cst_11 = arith.constant 0.000000e+00 : f32
    %13 = vector.broadcast %cst_11 : f32 to vector<8x96xf32>
    %14 = arith.maximumf %12, %13 : vector<8x96xf32>
    %c0_12 = arith.constant 0 : index
    %c0_13 = arith.constant 0 : index
    %15 = vector.load %arg5[%c0_12, %c0_13] : memref<96x128xf32, #tpu.memory_space<vmem>>, vector<96x128xf32>
    %cst_14 = arith.constant dense<0.000000e+00> : vector<8x128xf32>
    %16 = tpu.matmul %14, %15, %cst_14 {dimension_numbers = #tpu.dot_dimension_numbers<[1], [0], [0], [1], [0, 0, 1, 1], [], []>} : vector<8x96xf32>, vector<96x128xf32>, vector<8x128xf32> -> vector<8x128xf32>
    %c0_15 = arith.constant 0 : index
    %c0_16 = arith.constant 0 : index
    %17 = vector.load %arg6[%c0_15, %c0_16] : memref<1x128xf32, #tpu.memory_space<vmem>>, vector<1x128xf32>
    %18 = vector.broadcast %17 : vector<1x128xf32> to vector<8x128xf32>
    %19 = arith.addf %16, %18 : vector<8x128xf32>
    %20 = tpu.iota {dimensions = array<i32: 1>} : vector<8x128xi32>
    %21 = math.tanh %19 : vector<8x128xf32>
    %cst_17 = arith.constant 0.000000e+00 : f32
    %22 = vector.broadcast %cst_17 : f32 to vector<8x128xf32>
    %23 = arith.subf %22, %19 : vector<8x128xf32>
    %24 = math.exp %23 : vector<8x128xf32>
    %cst_18 = arith.constant 1.000000e+00 : f32
    %25 = vector.broadcast %cst_18 : f32 to vector<8x128xf32>
    %26 = arith.addf %25, %24 : vector<8x128xf32>
    %27 = tpu.reciprocal %26 {approx = true} : vector<8x128xf32> -> vector<8x128xf32>
    %c4_i32 = arith.constant 4 : i32
    %28 = vector.broadcast %c4_i32 : i32 to vector<8x128xi32>
    %29 = arith.cmpi slt, %20, %28 : vector<8x128xi32>
    %c8_i32 = arith.constant 8 : i32
    %30 = vector.broadcast %c8_i32 : i32 to vector<8x128xi32>
    %31 = arith.cmpi slt, %20, %30 : vector<8x128xi32>
    %32 = arith.select %31, %27, %19 : vector<8x128xi1>, vector<8x128xf32>
    %33 = arith.select %29, %21, %32 : vector<8x128xi1>, vector<8x128xf32>
    %c0_19 = arith.constant 0 : index
    %c0_20 = arith.constant 0 : index
    %34 = vector.load %arg7[%c0_19, %c0_20] : memref<8x128xf32, #tpu.memory_space<vmem>>, vector<8x128xf32>
    tpu.vector_store %arg7[%c0_19, %c0_20], %33 {strides = array<i32>} : memref<8x128xf32, #tpu.memory_space<vmem>>, vector<8x128xf32>,
    return
  }
}

</mosaic_0001>

<bundles_post_ra>
// kernel: tpu_custom_call.1
= control target key start
LH: loop header
LB: loop body
LE: loop exit
PB: predicated region body
PF: predicated region fallthrough
CT: control target
= control target key end

     0   :  { %12 = vsyncpa [#allocation3], 0  ;;  %s783_s0 = inlined_call_operand.hbm [shape: f32[8,16], index: 0, kind: input, shape index: {}]   ;;  %s784_s1 = inlined_call_operand.hbm [shape: f32[16,192], index: 1, kind: input, shape index: {}]   ;;  %s785_s2 = inlined_call_operand.vmem [shape: f32[1,192], index: 2, kind: input, shape index: {}]   ;;  %s786_s3 = inlined_call_operand.hbm [shape: f32[192,96], index: 3, kind: input, shape index: {}]   ;;  %s787_s4 = inlined_call_operand.vmem [shape: f32[1,96], index: 4, kind: input, shape index: {}]   ;;  %s788_s5 = inlined_call_operand.hbm [shape: f32[96,128], index: 5, kind: input, shape index: {}]   ;;  %s789_s6 = inlined_call_operand.vmem [shape: f32[1,128], index: 6, kind: input, shape index: {}]   ;;  %s790_s7 = inlined_call_operand.hbm [shape: f32[8,128], index: 7, kind: output, shape index: {}]  }
   0x1   :  { %13 = vsyncpa [#allocation6], 0 }
   0x2   :  { %14 = vsyncpa [#allocation9], 0 }
   0x3   :  { %15 = vsyncpa [#allocation4], 0  ;;  %s642_s24 = smov [#allocation5]   ;;  %s524_s28 = scalar_lea.hbm %s784_s1, 512 }
   0x4   :  { %s31_s25 = sshll.u32 %s642_s24, 4  ;;  %p525_p0 = scmp.ne.s32.totalorder %s784_s1, %s524_s28  ;;  %s32_s25 = int_to_ptr.vmem [resolvable:$true] %s31_s25 }
   0x5   :  { %p528_p1 = scmp.lt.u32.totalorder %s524_s28, %s784_s1 }
   0x7   :  { %p530_p2 = pnand %p528_p1, %p525_p0 }
   0x9   :  { %533 = shalt.err (!%p530_p2)
}
   0xa   :  { %s534_s10 = scalar_lea.vmem %s32_s25, 512  ;;  %p539_p4 = scmp.lt.s32.totalorder %s32_s25, %s32_s25 }
   0xb   :  { %p535_p3 = scmp.ne.s32.totalorder %s32_s25, %s534_s10  ;;  %p540_p5 = scmp.lt.s32.totalorder %s534_s10, %s534_s10 }
   0xd   :  { %p541_p6 = por %p540_p5, %p539_p4 }
   0xf   :  { %p542_p7 = pnand %p541_p6, %p535_p3 }
  0x11   :  { %545 = shalt.err (!%p542_p7)
}
  0x12   :  { %s643_s11 = smov 256   ;;  %s644_s12 = smov 16  }
  0x13   :  { %37 = dma.hbm_to_vmem [thread:$0]  %s784_s1, 512, %s32_s25, [#allocation6], %s643_s11, %s643_s11, %s644_s12  }
  0x14   :  { %s645_s15 = smov [#allocation2]   ;;  %s646_s17 = smov [#allocation7]  }
  0x15   :  { %s22_s16 = sshll.u32 %s645_s15, 4  ;;  %s45_s18 = sshll.u32 %s646_s17, 4  ;;  %s23_s16 = int_to_ptr.vmem [resolvable:$true] %s22_s16  ;;  %s46_s18 = int_to_ptr.vmem [resolvable:$true] %s45_s18 }
  0x16   :  { %s546_s21 = scalar_lea.hbm %s783_s0, 128 }
  0x17   :  { %p547_p8 = scmp.ne.s32.totalorder %s783_s0, %s546_s21  ;;  %p550_p9 = scmp.lt.u32.totalorder %s546_s21, %s783_s0 }
  0x19   :  { %p552_p10 = pnand %p550_p9, %p547_p8 }
  0x1b   :  { %555 = shalt.err (!%p552_p10)
}
  0x1c   :  { %s556_s1 = scalar_lea.vmem %s23_s16, 128  ;;  %p561_p12 = scmp.lt.s32.totalorder %s23_s16, %s23_s16 }
  0x1d   :  { %p557_p11 = scmp.ne.s32.totalorder %s23_s16, %s556_s1  ;;  %p562_p13 = scmp.lt.s32.totalorder %s556_s1, %s556_s1 }
  0x1f   :  { %p563_p0 = por %p562_p13, %p561_p12 }
  0x21   :  { %p564_p1 = pnand %p563_p0, %p557_p11 }
  0x23   :  { %567 = shalt.err (!%p564_p1)
}
  0x24   :  { %25 = dma.hbm_to_vmem [thread:$0]  %s783_s0, 128, %s23_s16, [#allocation3]  }
  0x25   :  { %s568_s30 = scalar_lea.hbm %s786_s3, 3072 }
  0x26   :  { %p569_p2 = scmp.ne.s32.totalorder %s786_s3, %s568_s30  ;;  %p572_p3 = scmp.lt.u32.totalorder %s568_s30, %s786_s3 }
  0x28   :  { %p574_p4 = pnand %p572_p3, %p569_p2 }
  0x2a   :  { %577 = shalt.err (!%p574_p4)
}
  0x2b   :  { %s578_s12 = scalar_lea.vmem %s46_s18, 3072  ;;  %p583_p6 = scmp.lt.s32.totalorder %s46_s18, %s46_s18 }
  0x2c   :  { %p579_p5 = scmp.ne.s32.totalorder %s46_s18, %s578_s12  ;;  %p584_p7 = scmp.lt.s32.totalorder %s578_s12, %s578_s12 }
  0x2e   :  { %p585_p8 = por %p584_p7, %p583_p6 }
  0x30   :  { %p586_p9 = pnand %p585_p8, %p579_p5 }
  0x32   :  { %589 = shalt.err (!%p586_p9)
}
  0x33   :  { %s647_s0 = smov 128   ;;  %s648_s13 = smov 8  }
  0x34   :  { %51 = dma.hbm_to_vmem [thread:$0]  %s786_s3, 3072, %s46_s18, [#allocation6], %s647_s0, %s647_s0, %s648_s13  }
  0x35   :  { %s649_s16 = smov [#allocation8]   ;;  %s590_s21 = scalar_lea.hbm %s788_s5, 1536 }
  0x36   :  { %s59_s17 = sshll.u32 %s649_s16, 4  ;;  %p591_p10 = scmp.ne.s32.totalorder %s788_s5, %s590_s21  ;;  %s60_s17 = int_to_ptr.vmem [resolvable:$true] %s59_s17 }
  0x37   :  { %p594_p11 = scmp.lt.u32.totalorder %s590_s21, %s788_s5 }
  0x39   :  { %p596_p12 = pnand %p594_p11, %p591_p10 }
  0x3b   :  { %599 = shalt.err (!%p596_p12)
}
  0x3c   :  { %s600_s1 = scalar_lea.vmem %s60_s17, 1536  ;;  %p605_p0 = scmp.lt.s32.totalorder %s60_s17, %s60_s17 }
  0x3d   :  { %p601_p13 = scmp.ne.s32.totalorder %s60_s17, %s600_s1  ;;  %p606_p1 = scmp.lt.s32.totalorder %s600_s1, %s600_s1 }
  0x3f   :  { %p607_p2 = por %p606_p1, %p605_p0 }
  0x41   :  { %p608_p3 = pnand %p607_p2, %p601_p13 }
  0x43   :  { %611 = shalt.err (!%p608_p3)
}
  0x44   :  { %65 = dma.hbm_to_vmem [thread:$0]  %s788_s5, 1536, %s60_s17, [#allocation9], %s647_s0, %s647_s0, %s648_s13  }
  0x45   :  { %634 = dma.done.wait [#allocation3], 128  }
  0x46   :  { %635 = vsyncadd [#allocation3], 4294967168 }
  0x47   :  { %636 = dma.done.wait [#allocation6], 3584  }
  0x48   :  { %637 = vsyncadd [#allocation6], 4294963712 }
  0x49   :  { %638 = dma.done.wait [#allocation9], 1536  }
  0x4a   :  { %639 = vsyncadd [#allocation9], 4294965760  ;;  %v650_v0 = vmov 0.0   ;;  %v651_v1 = vmov 0.0|0.0   ;;  %v82_v2 = vld [vmem:[#allocation5 + $0x8] sm:$0xff]  ;;  %v84_v3 = vld [vmem:[#allocation5 + $0x18] sm:$0xff]  ;;  %v87_v60 = vlaneseq }
  0x4b   :  { %165 = vmatprep.mubr.f32.mxu0 %v650_v0  ;;  %452 = vmatprep.subr.bf16.mxu1 %v651_v1  ;;  %v81_v4 = vld [vmem:[#allocation5] sm:$0xff]  ;;  %v448_v5 = vpack.c.bf16 %v84_v3, %v82_v2  ;;  %v83_v6 = vld [vmem:[#allocation5 + $0x10] sm:$0xff]  ;;  %v175_v9 = vld [vmem:[#allocation7 + $0x8] sm:$0xff]  ;;  %vm97_vm0 = vcmask 130048   ;;  %vm205_vm1 = vcmask 523264   ;;  %vm652_vm2 = vmmov 0  }
  0x4c   :  { %v174_v7 = vld [vmem:[#allocation7] sm:$0xff]  ;;  %v450_v8 = vpack.c.bf16 %v83_v6, %v81_v4  ;;  %v176_v10 = vld [vmem:[#allocation7 + $0x10] sm:$0xff]  ;;  %v177_v11 = vld [vmem:[#allocation7 + $0x18] sm:$0xff]  ;;  %v88_v61 = vshrl.u32 %v87_v60, 7  ;;  %vm299_vm3 = vcmask 785408  }
  0x4d   :  { %449 = vmatprep.subr.bf16.mxu0 %v448_v5  ;;  %v453_v12 = vpack.c.bf16 %v175_v9, %v174_v7  ;;  %v80_v13 = vld [vmem:[#allocation2] sm:$0xff]  ;;  %v456_v14 = vpack.c.bf16 %v177_v11, %v176_v10  ;;  %v178_v15 = vld [vmem:[#allocation7 + $0x20] sm:$0xff]  ;;  %v179_v16 = vld [vmem:[#allocation7 + $0x28] sm:$0xff] }
  0x4e   :  { %451 = vmatpush1.bf16.msra.mxu0 %v450_v8  ;;  %v459_v17 = vpack.c.bf16 %v179_v16, %v178_v15  ;;  %v180_v18 = vld [vmem:[#allocation7 + $0x30] sm:$0xff]  ;;  %v181_v19 = vld [vmem:[#allocation7 + $0x38] sm:$0xff]  ;;  %v182_v21 = vld [vmem:[#allocation7 + $0x40] sm:$0xff]  ;;  %v89_v62 = vsub.s32 0, %v88_v61  ;;  %v93_v2 = vsub.s32 1, %v88_v61 }
  0x4f   :  { %454 = vmatpush1.bf16.msra.mxu1 %v453_v12  ;;  %488 = vmatprep.subr.bf16.mxu0 %v651_v1  ;;  %v462_v20 = vpack.c.bf16 %v181_v19, %v180_v18  ;;  %v183_v22 = vld [vmem:[#allocation7 + $0x48] sm:$0xff]  ;;  %v184_v24 = vld [vmem:[#allocation7 + $0x50] sm:$0xff]  ;;  %v185_v25 = vld [vmem:[#allocation7 + $0x58] sm:$0xff] }
  0x50   :  { %455 = vmatprep.subr.bf16.mxu1 %v651_v1  ;;  %v465_v23 = vpack.c.bf16 %v183_v22, %v182_v21  ;;  %v468_v26 = vpack.c.bf16 %v185_v25, %v184_v24  ;;  %v186_v27 = vld [vmem:[#allocation7 + $0x60] sm:$0xff]  ;;  %v187_v28 = vld [vmem:[#allocation7 + $0x68] sm:$0xff]  ;;  %v188_v30 = vld [vmem:[#allocation7 + $0x70] sm:$0xff]  ;;  %v374_v25 = vand.u32 127, %v87_v60 }
  0x51   :  { %403 = vmatmul.mubr.msk.f32.vlgmr.msra.gmra.mrb[0].mxu0 %vm97_vm0, %v80_v13  ;;  %v471_v29 = vpack.c.bf16 %v187_v28, %v186_v27  ;;  %v189_v31 = vld [vmem:[#allocation7 + $0x78] sm:$0xff]  ;;  %v190_v33 = vld [vmem:[#allocation7 + $0x80] sm:$0xff]  ;;  %v191_v34 = vld [vmem:[#allocation7 + $0x88] sm:$0xff] }
  0x52   :  { %v474_v32 = vpack.c.bf16 %v189_v31, %v188_v30  ;;  %v477_v35 = vpack.c.bf16 %v191_v34, %v190_v33  ;;  %v192_v36 = vld [vmem:[#allocation7 + $0x90] sm:$0xff]  ;;  %v193_v37 = vld [vmem:[#allocation7 + $0x98] sm:$0xff]  ;;  %v194_v39 = vld [vmem:[#allocation7 + $0xa0] sm:$0xff]  ;;  %445 = vmatprep.mubr.msk.f32.mxu0 %vm652_vm2, %v650_v0  ;;  %vm382_vm4 = vcmp.lt.s32.totalorder %v374_v25, 8  ;;  %vm381_vm5 = vcmp.lt.s32.totalorder %v374_v25, 4 }
  0x53   :  { %457 = vmatpush1.bf16.msra.mxu1 %v456_v14  ;;  %v480_v38 = vpack.c.bf16 %v193_v37, %v192_v36  ;;  %v195_v40 = vld [vmem:[#allocation7 + $0xa8] sm:$0xff]  ;;  %v196_v42 = vld [vmem:[#allocation7 + $0xb0] sm:$0xff]  ;;  %v197_v43 = vld [vmem:[#allocation7 + $0xb8] sm:$0xff] }
  0x54   :  { %458 = vmatprep.subr.bf16.mxu1 %v651_v1  ;;  %v483_v41 = vpack.c.bf16 %v195_v40, %v194_v39  ;;  %v486_v44 = vpack.c.bf16 %v197_v43, %v196_v42  ;;  %v280_v45 = vld [vmem:[#allocation8] sm:$0xff]  ;;  %v281_v46 = vld [vmem:[#allocation8 + $0x8] sm:$0xff]  ;;  %v282_v47 = vld [vmem:[#allocation8 + $0x10] sm:$0xff] }
  0x55   :  { %v489_v48 = vpack.c.bf16 %v281_v46, %v280_v45  ;;  %v283_v49 = vld [vmem:[#allocation8 + $0x18] sm:$0xff]  ;;  %v284_v51 = vld [vmem:[#allocation8 + $0x20] sm:$0xff]  ;;  %v285_v52 = vld [vmem:[#allocation8 + $0x28] sm:$0xff] }
  0x56   :  { %v492_v50 = vpack.c.bf16 %v283_v49, %v282_v47  ;;  %v495_v53 = vpack.c.bf16 %v285_v52, %v284_v51  ;;  %v286_v54 = vld [vmem:[#allocation8 + $0x30] sm:$0xff]  ;;  %v287_v55 = vld [vmem:[#allocation8 + $0x38] sm:$0xff]  ;;  %v288_v57 = vld [vmem:[#allocation8 + $0x40] sm:$0xff] }
  0x57   :  { %460 = vmatpush1.bf16.msra.mxu1 %v459_v17  ;;  %490 = vmatpush3.bf16.msra.mxu0 %v489_v48  ;;  %v498_v56 = vpack.c.bf16 %v287_v55, %v286_v54  ;;  %v289_v58 = vld [vmem:[#allocation8 + $0x48] sm:$0xff]  ;;  %v85_v63 = vld [vmem:[%s785_s2] sm:$0x3] }
  0x58   :  { %461 = vmatprep.subr.bf16.mxu1 %v651_v1  ;;  %491 = vmatprep.subr.bf16.mxu0 %v651_v1  ;;  %v501_v59 = vpack.c.bf16 %v289_v58, %v288_v57  ;;  %v90_v3 = vrot.slane %v85_v63, %v89_v62  ;;  %v94_v4 = vrot.slane %v85_v63, %v93_v2  ;;  %v291_v11 = vld [vmem:[#allocation8 + $0x58] sm:$0xff] }
  0x59   :  { %v404_v13 = vld [vmem:[%s787_s4] ss:$0 sm:$0xff]  ;;  %s653_s4 = smov [#allocation10]  }
  0x5a   :  { %v406_v18 = vld [vmem:[%s789_s6] ss:$0 sm:$0xff]  ;;  %s392_s30 = sshll.u32 %s653_s4, 4  ;;  %s393_s30 = int_to_ptr.vmem [resolvable:$true] %s392_s30 }
  0x5b   :  { %463 = vmatpush1.bf16.msra.mxu1 %v462_v20  ;;  %493 = vmatpush3.bf16.msra.mxu0 %v492_v50  ;;  %s612_s6 = scalar_lea.vmem %s393_s30, 128  ;;  %p617_p5 = scmp.lt.s32.totalorder %s393_s30, %s393_s30 }
  0x5c   :  { %464 = vmatprep.subr.bf16.mxu1 %v651_v1  ;;  %494 = vmatprep.subr.bf16.mxu0 %v651_v1  ;;  %p613_p4 = scmp.ne.s32.totalorder %s393_s30, %s612_s6  ;;  %p618_p6 = scmp.lt.s32.totalorder %s612_s6, %s612_s6 }
  0x5e   :  { %p619_p7 = por %p618_p6, %p617_p5 }
  0x5f   :  { %466 = vmatpush1.bf16.msra.mxu1 %v465_v23  ;;  %496 = vmatpush3.bf16.msra.mxu0 %v495_v53 }
  0x60   :  { %467 = vmatprep.subr.bf16.mxu1 %v651_v1  ;;  %497 = vmatprep.subr.bf16.mxu0 %v651_v1  ;;  %p620_p8 = pnand %p619_p7, %p613_p4 }
  0x63   :  { %469 = vmatpush1.bf16.msra.mxu1 %v468_v26  ;;  %499 = vmatpush3.bf16.msra.mxu0 %v498_v56 }
  0x64   :  { %470 = vmatprep.subr.bf16.mxu1 %v651_v1  ;;  %500 = vmatprep.subr.bf16.mxu0 %v651_v1 }
  0x67   :  { %472 = vmatpush1.bf16.msra.mxu1 %v471_v29  ;;  %502 = vmatpush3.bf16.msra.mxu0 %v501_v59 }
  0x68   :  { %473 = vmatprep.subr.bf16.mxu1 %v651_v1  ;;  %503 = vmatprep.subr.bf16.mxu0 %v651_v1 }
  0x6b   :  { %475 = vmatpush1.bf16.msra.mxu1 %v474_v32 }
  0x6c   :  { %476 = vmatprep.subr.bf16.mxu1 %v651_v1 }
  0x6f   :  { %478 = vmatpush1.bf16.msra.mxu1 %v477_v35 }
  0x70   :  { %479 = vmatprep.subr.bf16.mxu1 %v651_v1 }
  0x73   :  { %481 = vmatpush1.bf16.msra.mxu1 %v480_v38 }
  0x74   :  { %482 = vmatprep.subr.bf16.mxu1 %v651_v1 }
  0x77   :  { %484 = vmatpush1.bf16.msra.mxu1 %v483_v41 }
  0x78   :  { %485 = vmatprep.subr.bf16.mxu1 %v651_v1  ;;  %v290_v1 = vld [vmem:[#allocation8 + $0x50] sm:$0xff] }
  0x79   :  { %v504_v12 = vpack.c.bf16 %v291_v11, %v290_v1 }
  0x7b   :  { %487 = vmatpush1.bf16.msra.mxu1 %v486_v44  ;;  %505 = vmatpush3.bf16.msra.mxu0 %v504_v12 }
 0x124   :  { %v167_v5 = vpop.f32.mrb[0].mxu0 }
 0x125   :  { %v168_v6 = vadd.f32 %v167_v5, %v90_v3  ;;  %v169_v7 = vpop.f32.mrb[1].mxu0 }
 0x126   :  { %v170_v8 = vadd.f32 %v169_v7, %v94_v4 }
 0x127   :  { %v172_v10 = vmax.f32 %v168_v6, 0.0 }
 0x128   :  { %v173_v9 = vmax.f32 %v170_v8, 0.0 }
 0x12a   :  { %405 = vmatprep.mubr.msk.f32.mxu1 %vm205_vm1, %v173_v9 }
 0x12b   :  { %274 = vmatmul.mubr.f32.vlgmr.msra.gmra.mrb[0].mxu1 %v172_v10 }
 0x1fe   :  { %v275_v14 = vpop.f32.mrb[0].mxu1 }
 0x1ff   :  { %v276_v15 = vadd.f32 %v404_v13, %v275_v14  ;;  %v277_v16 = vpop.f32.mrb[1].mxu1 }
 0x201   :  { %v279_v17 = vmax.f32 %v276_v15, 0.0 }
 0x203   :  { %446 = vmatmul.mubr.msk.f32.vlgmr.msra.gmra.mrb[2].mxu0 %vm299_vm3, %v279_v17 }
 0x2d6   :  { %v369_v19 = vpop.f32.mrb[2].mxu0 }
 0x2d7   :  { %v370_v20 = vadd.f32 %v406_v18, %v369_v19  ;;  %v447_v21 = vpop.f32.mrb[3].mxu0 }
 0x2d9   :  { %v376_v22 = vsub.f32 0.0, %v370_v20 }
 0x2db   :  { %v377_v23 = vmul.f32 1.442695, %v376_v22 }
 0x2dd   :  { %518 = vpow2.f32 %v377_v23 }
 0x2e7   :  { %v519_v0 = vpop.eup %518 }
 0x2e8   :  { %v379_v24 = vadd.f32 1.0, %v519_v0 }
 0x2ea   :  { %520 = vrcp.f32 %v379_v24 }
 0x2eb   :  { %522 = vtanh.f32 %v370_v20 }
 0x2f4   :  { %v521_v26 = vpop.eup %520 }
 0x2f5   :  { %v523_v27 = vpop.eup %522  ;;  %v383_v28 = vsel %vm382_vm4, %v521_v26, %v370_v20 }
 0x2f6   :  { %v384_v29 = vsel %vm381_vm5, %v523_v27, %v383_v28 }
 0x2f7   :  { %385 = vst [vmem:[#allocation10] sm:$0xff] %v384_v29 }
 0x2f8   :  { %623 = shalt.err (!%p620_p8)
}
 0x2f9   :  { %s624_s10 = scalar_lea.hbm %s790_s7, 128 }
 0x2fa   :  { %p625_p9 = scmp.ne.s32.totalorder %s790_s7, %s624_s10  ;;  %p628_p10 = scmp.lt.u32.totalorder %s624_s10, %s790_s7 }
 0x2fc   :  { %p630_p11 = pnand %p628_p10, %p625_p9 }
 0x2fe   :  { %633 = shalt.err (!%p630_p11)
}
 0x2ff   :  { %395 = dma.vmem_to_hbm [thread:$0]  %s393_s30, 128, %s790_s7, [#allocation4]  }
 0x300   :  { %640 = dma.done.wait [#allocation4], 128  }
 0x301   :  { %641 = vsyncadd [#allocation4], 4294967168 }
 0x302   :  { %399 = vsyncpa [#allocation3], 1 }
 0x303   :  { %400 = vsyncpa [#allocation6], 1 }
 0x304   :  { %401 = vsyncpa [#allocation9], 1 }
 0x305   :  { %402 = vsyncpa [#allocation4], 1 }

</bundles_post_ra>
